<compile_context>
chip_gen: v7x
topology: tpu7x:2x2x1
jax: 0.10.0
libtpu: 0.0.40
codegen_flags: <defaults>
</compile_context>

<pallas_src>
import functools
import math

import numpy as np
import jax
import jax.numpy as jnp
from jax.experimental import pallas as pl
from jax.experimental.pallas import tpu as pltpu

IMG = 32
PATCH = 4
IN_CH = 3
EMBED = 32
DEPTHS = (2, 2)
HEADS = (2, 4)
WINDOW = 4
MLP_RATIO = 4
NUM_LABELS = 10
LN_EPS = 1e-5
LOG_MAX = math.log(1.0 / 0.01)   # logit_scale clamp, as in Swinv2SelfAttention


# ------------------------------ in-kernel math -------------------------------
def _ln(x, g, b, eps):
    mu = jnp.mean(x, axis=-1, keepdims=True)
    var = jnp.mean((x - mu) * (x - mu), axis=-1, keepdims=True)
    return (x - mu) * jax.lax.rsqrt(var + eps) * g + b


def _gelu_erf(x):
    # Exact (erf) GELU.  erf via Abramowitz-Stegun 7.1.26 polynomial,
    # |err| <= 1.5e-7 (~f32 eps), using only VPU + one EUP exp.
    # TODO(synk): switch to lax.erf if/when Mosaic erf lowering is guaranteed.
    z = x * 0.7071067811865476
    s = jnp.sign(z)
    a = jnp.abs(z)
    t = 1.0 / (1.0 + 0.3275911 * a)
    poly = t * (0.254829592 + t * (-0.284496736 + t * (1.421413741
               + t * (-1.453152027 + t * 1.061405429))))
    erf = s * (1.0 - poly * jnp.exp(-a * a))
    return 0.5 * x * (1.0 + erf)


# ------------------------------ Pallas kernels -------------------------------
def _cpb_kernel(x_ref, w1_ref, b1_ref, w2_ref, o_ref):
    # continuous relative position bias MLP: Linear -> ReLU -> Linear(no bias)
    h = jnp.dot(x_ref[...], w1_ref[...],
                preferred_element_type=jnp.float32) + b1_ref[...]
    o_ref[...] = jnp.dot(jnp.maximum(h, 0.0), w2_ref[...],
                         preferred_element_type=jnp.float32)


def _linear_ln_kernel(x_ref, w_ref, v_ref, o_ref, *, eps):
    # y = LN(x @ W + b); v_ref rows: [bias, gamma, beta]
    v = v_ref[...]
    y = jnp.dot(x_ref[...], w_ref[...],
                preferred_element_type=jnp.float32) + v[0:1]
    o_ref[...] = _ln(y, v[1:2], v[2:3], eps)


def _head_kernel(x_ref, v_ref, w_ref, cb_ref, o_ref, *, eps):
    # final LayerNorm + AdaptiveAvgPool1d(1) over tokens + classifier Linear
    v = v_ref[...]                                   # (2, C): [gamma, beta]
    xn = _ln(x_ref[...], v[0:1], v[1:2], eps)        # (B, L, C)
    pooled = jnp.mean(xn, axis=1)                    # (B, C)
    o_ref[...] = jnp.dot(pooled, w_ref[...],
                         preferred_element_type=jnp.float32) + cb_ref[...]


def _swin_block_kernel(xw_ref, bias_ref, qkvw_ref, qkvb_ref, projw_ref,
                       vec_ref, fc1w_ref, fc1b_ref, fc2w_ref, scale_ref,
                       o_ref, *, num_heads, head_dim, eps):
    # One window of one Swin block, fully fused:
    #   QKV proj + per-head cosine attention (block-diagonal by construction,
    #   heads accumulated straight into the output projection) + proj bias +
    #   res-post-norm LN + residual + fc1 -> GELU(erf) -> fc2 + LN + residual.
    n = xw_ref.shape[1]
    c = xw_ref.shape[2]
    x = xw_ref[0]                                    # (n, c) tokens of window
    bias = bias_ref[0]                               # (nh, n, n) rel bias + shift mask
    scale = scale_ref[...]                           # (nh, 1) exp(clamped logit_scale)
    vecs = vec_ref[...]                              # (6, c)
    proj_b, ln1_g, ln1_b = vecs[0:1], vecs[1:2], vecs[2:3]
    fc2_b, ln2_g, ln2_b = vecs[3:4], vecs[4:5], vecs[5:6]

    qkv = jnp.dot(x, qkvw_ref[...],
                  preferred_element_type=jnp.float32) + qkvb_ref[...]   # (n, 3c)

    y = jnp.zeros((n, c), jnp.float32)
    for h in range(num_heads):
        lo = h * head_dim
        q = qkv[:, lo:lo + head_dim]
        k = qkv[:, c + lo:c + lo + head_dim]
        v = qkv[:, 2 * c + lo:2 * c + lo + head_dim]
        # cosine attention: F.normalize(q/k, eps=1e-12) via rsqrt-multiply,
        # logit scale folded into the normalized q.
        qn = q * jax.lax.rsqrt(jnp.maximum(jnp.sum(q * q, -1, keepdims=True),
                                           1e-24))
        kn = k * jax.lax.rsqrt(jnp.maximum(jnp.sum(k * k, -1, keepdims=True),
                                           1e-24))
        qn = qn * scale[h:h + 1]
        s = jax.lax.dot_general(qn, kn, (((1,), (1,)), ((), ())),
                                preferred_element_type=jnp.float32)      # (n, n)
        s = s + bias[h]
        s = s - jnp.max(s, axis=-1, keepdims=True)
        p = jnp.exp(s)
        p = p / jnp.sum(p, axis=-1, keepdims=True)                       # exact softmax
        o_h = jnp.dot(p, v, preferred_element_type=jnp.float32)          # (n, hd)
        # concat(heads) @ proj_w  ==  sum_h o_h @ proj_w[h*hd:(h+1)*hd, :]
        y = y + jnp.dot(o_h, projw_ref[lo:lo + head_dim, :],
                        preferred_element_type=jnp.float32)
    y = y + proj_b
    x1 = x + _ln(y, ln1_g, ln1_b, eps)               # SwinV2 res-post-norm

    hmid = jnp.dot(x1, fc1w_ref[...],
                   preferred_element_type=jnp.float32) + fc1b_ref[...]
    hmid = _gelu_erf(hmid)
    y2 = jnp.dot(hmid, fc2w_ref[...],
                 preferred_element_type=jnp.float32) + fc2_b
    o_ref[0] = x1 + _ln(y2, ln2_g, ln2_b, eps)


# ------------------------------ thin wrappers --------------------------------
def _call(kernel, out_shape, *args):
    # Tiny single-shot kernels: whole arrays resident in VMEM (default specs).
    return pl.pallas_call(kernel, out_shape=out_shape)(*args)


def pallas_cpb(coords, w1, b1, w2):
    return _call(_cpb_kernel,
                 jax.ShapeDtypeStruct((coords.shape[0], w2.shape[1]),
                                      jnp.float32),
                 coords, w1, b1, w2)


def pallas_linear_ln(x, w, vecs):
    return _call(functools.partial(_linear_ln_kernel, eps=LN_EPS),
                 jax.ShapeDtypeStruct((x.shape[0], w.shape[1]), jnp.float32),
                 x, w, vecs)


def pallas_head(x3, lnv, w, cb):
    return _call(functools.partial(_head_kernel, eps=LN_EPS),
                 jax.ShapeDtypeStruct((x3.shape[0], w.shape[1]), jnp.float32),
                 x3, lnv, w, cb)


def pallas_swin_block(xw, p):
    # Fused block kernel, gridded over windows (block-diagonal attention;
    # "parallel" -> both TensorCores on v7x; weights resident via constant
    # index maps so they are DMA'd only once per call).
    bw, n, c = xw.shape
    nh = p["num_heads"]
    hd = c // nh
    nW = p["bias"].shape[0]
    hidden = p["fc1_w"].shape[1]
    kern = functools.partial(_swin_block_kernel, num_heads=nh, head_dim=hd,
                             eps=LN_EPS)
    win = lambda wi: (wi, 0, 0)
    bmap = lambda wi: (wi % nW, 0, 0, 0)     # per-window shift mask / rel bias
    c2 = lambda wi: (0, 0)
    return pl.pallas_call(
        kern,
        out_shape=jax.ShapeDtypeStruct((bw, n, c), jnp.float32),
        grid=(bw,),
        in_specs=[
            pl.BlockSpec((1, n, c), win),          # window tokens
            pl.BlockSpec((1, nh, n, n), bmap),     # precomputed bias+mask
            pl.BlockSpec((c, 3 * c), c2),          # fused qkv weight
            pl.BlockSpec((1, 3 * c), c2),          # fused qkv bias (k bias = 0)
            pl.BlockSpec((c, c), c2),              # output projection
            pl.BlockSpec((6, c), c2),              # [proj_b, ln1_g, ln1_b, fc2_b, ln2_g, ln2_b]
            pl.BlockSpec((c, hidden), c2),         # fc1
            pl.BlockSpec((1, hidden), c2),         # fc1 bias
            pl.BlockSpec((hidden, c), c2),         # fc2
            pl.BlockSpec((nh, 1), c2),             # exp(clamped logit_scale)
        ],
        out_specs=pl.BlockSpec((1, n, c), win),
        compiler_params=pltpu.CompilerParams(
            dimension_semantics=("parallel",)),
    )(xw, p["bias"], p["qkv_w"], p["qkv_b"], p["proj_w"], p["vecs_c"],
      p["fc1_w"], p["fc1_b"], p["fc2_w"], p["scale"])


# --------------------------- static SwinV2 buffers ---------------------------
def _make_coords_table(ws):
    rng = np.arange(-(ws - 1), ws, dtype=np.float32)
    table = np.stack(np.meshgrid(rng, rng, indexing="ij"), axis=-1)
    table = table / float(ws - 1) * 8.0
    table = np.sign(table) * np.log2(np.abs(table) + 1.0) / np.log2(8.0)
    return jnp.asarray(table.reshape(-1, 2), jnp.float32)


def _make_rel_index(ws):
    coords = np.stack(np.meshgrid(np.arange(ws), np.arange(ws), indexing="ij"))
    flat = coords.reshape(2, -1)
    rel = (flat[:, :, None] - flat[:, None, :]).transpose(1, 2, 0).astype(np.int32)
    rel[:, :, 0] += ws - 1
    rel[:, :, 1] += ws - 1
    rel[:, :, 0] *= 2 * ws - 1
    return rel.sum(-1).reshape(-1).astype(np.int32)


def _make_shift_mask(h, w, ws, shift):
    # SwinV2 shifted-window additive mask, (nW, n, n) with 0 / -100 entries.
    n = ws * ws
    nW = (h // ws) * (w // ws)
    if shift == 0:
        return np.zeros((nW, n, n), np.float32)
    img = np.zeros((h, w), np.float32)
    slices = (slice(0, -ws), slice(-ws, -shift), slice(-shift, None))
    cnt = 0
    for hs in slices:
        for wss in slices:
            img[hs, wss] = cnt
            cnt += 1
    m = img.reshape(h // ws, ws, w // ws, ws).transpose(0, 2, 1, 3).reshape(nW, n)
    return np.where((m[:, None, :] - m[:, :, None]) != 0.0,
                    -100.0, 0.0).astype(np.float32)


# ------------------------- SwinV2 parameters (synthetic) ---------------------
def init_params(key):
    counter = [0]

    def nxt():
        counter[0] += 1
        return jax.random.fold_in(key, counter[0])

    def w(shape, scale=0.02):
        return scale * jax.random.normal(nxt(), shape, jnp.float32)

    params = {
        "patch_w": w((IN_CH * PATCH * PATCH, EMBED)),
        "patch_vecs": jnp.stack([w((EMBED,)),
                                 jnp.ones((EMBED,), jnp.float32),
                                 jnp.zeros((EMBED,), jnp.float32)]),
    }
    stages = []
    dim = EMBED
    res = IMG // PATCH
    for si, (depth, nh) in enumerate(zip(DEPTHS, HEADS)):
        ws = min(WINDOW, res)
        n = ws * ws
        blocks = []
        for bi in range(depth):
            shift = 0 if (bi % 2 == 0 or res <= WINDOW) else WINDOW // 2
            q_w, k_w, v_w = w((dim, dim)), w((dim, dim)), w((dim, dim))
            q_b, v_b = w((dim,)), w((dim,))
            logit_scale = jnp.full((nh, 1), math.log(10.0), jnp.float32)
            cpb_w1, cpb_b1, cpb_w2 = w((2, 512)), w((512,)), w((512, nh))

            # ---- input-independent precompute, hoisted out of the forward ----
            # CPB MLP (Pallas kernel, run once at init) + gather + 16*sigmoid.
            table = pallas_cpb(_make_coords_table(ws), cpb_w1,
                               cpb_b1.reshape(1, 512), cpb_w2)
            rel = table[jnp.asarray(_make_rel_index(ws))].reshape(n, n, nh)
            rel = 16.0 * jax.nn.sigmoid(jnp.transpose(rel, (2, 0, 1)))  # (nh,n,n)
            mask = jnp.asarray(_make_shift_mask(res, res, ws, shift))   # (nW,n,n)
            bias = mask[:, None, :, :] + rel[None, :, :, :]             # (nW,nh,n,n)
            scale = jnp.exp(jnp.minimum(logit_scale, LOG_MAX))          # (nh,1)

            blocks.append(dict(
                shift=shift, num_heads=nh, window=ws,
                # fused QKV projection; key projection has NO bias in SwinV2
                qkv_w=jnp.concatenate([q_w, k_w, v_w], axis=1),
                qkv_b=jnp.concatenate(
                    [q_b, jnp.zeros((dim,), jnp.float32), v_b]).reshape(1, 3 * dim),
                proj_w=w((dim, dim)),
                # [proj_b, ln1_g, ln1_b, fc2_b, ln2_g, ln2_b] stacked (6, dim)
                vecs_c=jnp.stack([w((dim,)),
                                  jnp.ones((dim,), jnp.float32),
                                  jnp.zeros((dim,), jnp.float32),
                                  w((dim,)),
                                  jnp.ones((dim,), jnp.float32),
                                  jnp.zeros((dim,), jnp.float32)]),
                fc1_w=w((dim, MLP_RATIO * dim)),
                fc1_b=w((MLP_RATIO * dim,)).reshape(1, MLP_RATIO * dim),
                fc2_w=w((MLP_RATIO * dim, dim)),
                scale=scale,
                bias=bias,
            ))
        stage = {"blocks": blocks}
        if si < len(DEPTHS) - 1:
            stage["red_w"] = w((4 * dim, 2 * dim))        # PatchMerging, no bias
            stage["merge_vecs"] = jnp.stack(
                [jnp.zeros((2 * dim,), jnp.float32),
                 jnp.ones((2 * dim,), jnp.float32),
                 jnp.zeros((2 * dim,), jnp.float32)])
            dim *= 2
            res //= 2
        stages.append(stage)
    params["stages"] = stages
    hidden = EMBED * 2 ** (len(DEPTHS) - 1)
    params["head_ln"] = jnp.stack([jnp.ones((hidden,), jnp.float32),
                                   jnp.zeros((hidden,), jnp.float32)])
    params["cls_w"] = w((hidden, NUM_LABELS))
    params["cls_b"] = w((NUM_LABELS,)).reshape(1, NUM_LABELS)
    return params
    # TODO(synk): pretrained-checkpoint loading (from_pretrained) is out of
    # scope; weights above are synthetic but deterministic.


# -------------------------------- forward pass -------------------------------
def _swin_block(hidden, bsz, h, w, c, p):
    ws, shift = p["window"], p["shift"]
    n = ws * ws
    # window partition (+ cyclic shift) kept in glue XLA: tiny permutations.
    # Attention, LayerNorms, residuals and the MLP are all per-token /
    # per-window, so running them in the windowed layout and un-permuting
    # afterwards is exactly equivalent to the HF ordering.
    x = hidden.reshape(bsz, h, w, c)
    if shift > 0:
        x = jnp.roll(x, (-shift, -shift), axis=(1, 2))
    xw = x.reshape(bsz, h // ws, ws, w // ws, ws, c)
    xw = xw.transpose(0, 1, 3, 2, 4, 5).reshape(-1, n, c)       # (B*nW, n, C)

    out_w = pallas_swin_block(xw, p)                            # fused block

    aw = out_w.reshape(bsz, h // ws, w // ws, ws, ws, c)
    aw = aw.transpose(0, 1, 3, 2, 4, 5).reshape(bsz, h, w, c)
    if shift > 0:
        aw = jnp.roll(aw, (shift, shift), axis=(1, 2))
    return aw.reshape(bsz * h * w, c)


def _patch_merge(hidden, bsz, h, w, c, stage):
    x = hidden.reshape(bsz, h, w, c)
    x = jnp.concatenate(
        [x[:, 0::2, 0::2], x[:, 1::2, 0::2], x[:, 0::2, 1::2], x[:, 1::2, 1::2]],
        axis=-1).reshape(bsz * (h // 2) * (w // 2), 4 * c)
    return pallas_linear_ln(x, stage["red_w"], stage["merge_vecs"])


def swinv2_forward(params, pixel_values):
    # pixel_values is NCHW float32, identical to the PyTorch module.
    bsz = pixel_values.shape[0]
    hp = wp = IMG // PATCH
    # Patch embedding: Conv2d(kernel=stride=PATCH) == im2col + fused linear+LN
    xp = pixel_values.reshape(bsz, IN_CH, hp, PATCH, wp, PATCH)
    xp = xp.transpose(0, 2, 4, 1, 3, 5).reshape(bsz * hp * wp,
                                                IN_CH * PATCH * PATCH)
    hidden = pallas_linear_ln(xp, params["patch_w"], params["patch_vecs"])

    h, w, dim = hp, wp, EMBED
    for stage in params["stages"]:
        for blk in stage["blocks"]:
            hidden = _swin_block(hidden, bsz, h, w, dim, blk)
        if "red_w" in stage:
            hidden = _patch_merge(hidden, bsz, h, w, dim, stage)
            h, w, dim = h // 2, w // 2, dim * 2

    # fused final LayerNorm + mean pool + classifier
    return pallas_head(hidden.reshape(bsz, h * w, dim),
                       params["head_ln"], params["cls_w"], params["cls_b"])


if __name__ == "__main__":
    key = jax.random.PRNGKey(0)
    pkey, xkey = jax.random.split(key)
    params = init_params(pkey)
    x = jax.random.normal(xkey, (2, IN_CH, IMG, IMG), jnp.float32)

    fwd = jax.jit(lambda pv: swinv2_forward(params, pv))
    logits = fwd(x)
    jax.block_until_ready(logits)
    assert logits.shape == (2, NUM_LABELS)
    assert bool(jnp.all(jnp.isfinite(logits)))
    print("KERNEL_OK")
</pallas_src>

<mosaic_0001>
module attributes {stable_mosaic.version = 11 : i64} {
  func.func @_cpb_kernel(%arg0: memref<49x2xf32, #tpu.memory_space<vmem>>, %arg1: memref<2x512xf32, #tpu.memory_space<vmem>>, %arg2: memref<1x512xf32, #tpu.memory_space<vmem>>, %arg3: memref<512x2xf32, #tpu.memory_space<vmem>>, %arg4: memref<49x2xf32, #tpu.memory_space<vmem>>) attributes {dimension_semantics = [], scalar_prefetch = 0 : i64, scratch_operands = 0 : i64, tpu.core_type = #tpu.core_type<tc>} {
    %c0 = arith.constant 0 : index
    %c0_0 = arith.constant 0 : index
    %0 = vector.load %arg0[%c0, %c0_0] : memref<49x2xf32, #tpu.memory_space<vmem>>, vector<49x2xf32>
    %c0_1 = arith.constant 0 : index
    %c0_2 = arith.constant 0 : index
    %1 = vector.load %arg1[%c0_1, %c0_2] : memref<2x512xf32, #tpu.memory_space<vmem>>, vector<2x512xf32>
    %cst = arith.constant dense<0.000000e+00> : vector<49x512xf32>
    %2 = tpu.matmul %0, %1, %cst {dimension_numbers = #tpu.dot_dimension_numbers<[1], [0], [0], [1], [0, 0, 1, 1], [], []>} : vector<49x2xf32>, vector<2x512xf32>, vector<49x512xf32> -> vector<49x512xf32>
    %c0_3 = arith.constant 0 : index
    %c0_4 = arith.constant 0 : index
    %3 = vector.load %arg2[%c0_3, %c0_4] : memref<1x512xf32, #tpu.memory_space<vmem>>, vector<1x512xf32>
    %4 = vector.broadcast %3 : vector<1x512xf32> to vector<49x512xf32>
    %5 = arith.addf %2, %4 : vector<49x512xf32>
    %cst_5 = arith.constant 0.000000e+00 : f32
    %6 = vector.broadcast %cst_5 : f32 to vector<49x512xf32>
    %7 = arith.maximumf %5, %6 : vector<49x512xf32>
    %c0_6 = arith.constant 0 : index
    %c0_7 = arith.constant 0 : index
    %8 = vector.load %arg3[%c0_6, %c0_7] : memref<512x2xf32, #tpu.memory_space<vmem>>, vector<512x2xf32>
    %cst_8 = arith.constant dense<0.000000e+00> : vector<49x2xf32>
    %9 = tpu.matmul %7, %8, %cst_8 {dimension_numbers = #tpu.dot_dimension_numbers<[1], [0], [0], [1], [0, 0, 1, 1], [], []>} : vector<49x512xf32>, vector<512x2xf32>, vector<49x2xf32> -> vector<49x2xf32>
    %c0_9 = arith.constant 0 : index
    %c0_10 = arith.constant 0 : index
    %10 = vector.load %arg4[%c0_9, %c0_10] : memref<49x2xf32, #tpu.memory_space<vmem>>, vector<49x2xf32>
    tpu.vector_store %arg4[%c0_9, %c0_10], %9 {strides = array<i32>} : memref<49x2xf32, #tpu.memory_space<vmem>>, vector<49x2xf32>,
    return
  }
}

</mosaic_0001>

<bundles_post_ra>
// kernel: tpu_custom_call.1
= control target key start
LH: loop header
LB: loop body
LE: loop exit
PB: predicated region body
PF: predicated region fallthrough
CT: control target
= control target key end

     0   :  { %v27_v0 = vlaneseq  ;;  %v805_v2 = vmov 1983009808   ;;  %v806_v4 = vmov 0.0   ;;  %vm87_vm0 = vcmask 1041408   ;;  %s1153_s1 = inlined_call_operand.vmem [shape: f32[2,512], index: 1, kind: input, shape index: {}]   ;;  %s1154_s3 = inlined_call_operand.vmem [shape: f32[512,2], index: 3, kind: input, shape index: {}]   ;;  %s1155_s0 = inlined_call_operand.vmem [shape: f32[49,2], index: 0, kind: input, shape index: {}]   ;;  %s1156_s2 = inlined_call_operand.vmem [shape: f32[1,512], index: 2, kind: input, shape index: {}]   ;;  %s1157_s4 = inlined_call_operand.vmem [shape: f32[49,2], index: 4, kind: output, shape index: {}]  }
   0x1   :  { %v24_v1 = vld [vmem:[%s1153_s1] sm:$0xff]  ;;  %v50_v3 = vunpack.c.l.s4 %v805_v2  ;;  %160 = vmatprep.mubr.f32.mxu0 %v806_v4  ;;  %267 = vmatprep.mubr.f32.mxu1 %v806_v4  ;;  %v355_v12 = vld [vmem:[%s1154_s3 + $0x88] sm:$0xff]  ;;  %vm65_vm1 = vcmask 15360   ;;  %v356_v24 = vld [vmem:[%s1154_s3 + $0x90] sm:$0xff]  ;;  %vm608_vm2 = vcmask 8192  }
   0x2   :  { %v837_v5 = vshrl.u32 %v27_v0, 7  ;;  %v48_v7 = vcombine.high %v24_v1, %v24_v1  ;;  %v354_v11 = vld [vmem:[%s1154_s3 + $0x80] sm:$0xff]  ;;  %v387_v14 = vld [vmem:[%s1154_s3 + $0x188] sm:$0xff]  ;;  %v357_v25 = vld [vmem:[%s1154_s3 + $0x98] sm:$0xff] }
   0x3   :  { %v51_v6 = vunpack.c.0.s8 %v50_v3  ;;  %v386_v13 = vld [vmem:[%s1154_s3 + $0x180] sm:$0xff]  ;;  %v339_v18 = vld [vmem:[%s1154_s3 + $0x8] sm:$0xff]  ;;  %v738_v22 = vpack.c.bf16 %v355_v12, %v354_v11  ;;  %v388_v28 = vld [vmem:[%s1154_s3 + $0x190] sm:$0xff]  ;;  %v742_v35 = vpack.c.bf16 %v357_v25, %v356_v24 }
   0x4   :  { %v338_v15 = vld [vmem:[%s1154_s3] sm:$0xff]  ;;  %v371_v20 = vld [vmem:[%s1154_s3 + $0x108] sm:$0xff]  ;;  %v770_v23 = vpack.c.bf16 %v387_v14, %v386_v13  ;;  %v389_v29 = vld [vmem:[%s1154_s3 + $0x198] sm:$0xff] }
   0x5   :  { %v54_v8 = vsub.s32 %v51_v6, %v837_v5  ;;  %v370_v19 = vld [vmem:[%s1154_s3 + $0x100] sm:$0xff]  ;;  %v740_v26 = vpack.c.bf16 %v339_v18, %v338_v15  ;;  %v340_v30 = vld [vmem:[%s1154_s3 + $0x10] sm:$0xff]  ;;  %v341_v31 = vld [vmem:[%s1154_s3 + $0x18] sm:$0xff]  ;;  %v774_v36 = vpack.c.bf16 %v389_v29, %v388_v28 }
   0x6   :  { %v17_v21 = vld [vmem:[%s1155_s0] sm:$0xff]  ;;  %v772_v27 = vpack.c.bf16 %v371_v20, %v370_v19  ;;  %v372_v32 = vld [vmem:[%s1154_s3 + $0x110] sm:$0xff]  ;;  %v373_v33 = vld [vmem:[%s1154_s3 + $0x118] sm:$0xff]  ;;  %v744_v39 = vpack.c.bf16 %v341_v31, %v340_v30 }
   0x7   :  { %v55_v9 = vrot.slane %v24_v1, %v54_v8  ;;  %v62_v10 = vrot.slane %v48_v7, %v54_v8  ;;  %v18_v34 = vld [vmem:[%s1155_s0 + $0x8] sm:$0xff]  ;;  %v358_v37 = vld [vmem:[%s1154_s3 + $0xa0] sm:$0xff]  ;;  %v776_v40 = vpack.c.bf16 %v373_v33, %v372_v32  ;;  %v19_v47 = vld [vmem:[%s1155_s0 + $0x10] sm:$0xff] }
   0x8   :  { %v359_v38 = vld [vmem:[%s1154_s3 + $0xa8] sm:$0xff]  ;;  %v390_v41 = vld [vmem:[%s1154_s3 + $0x1a0] sm:$0xff]  ;;  %v360_v50 = vld [vmem:[%s1154_s3 + $0xb0] sm:$0xff] }
   0x9   :  { %v63_v16 = vcombine.high %v55_v9, %v55_v9  ;;  %v64_v17 = vcombine.high %v62_v10, %v62_v10  ;;  %v391_v42 = vld [vmem:[%s1154_s3 + $0x1a8] sm:$0xff]  ;;  %v342_v43 = vld [vmem:[%s1154_s3 + $0x20] sm:$0xff]  ;;  %v746_v48 = vpack.c.bf16 %v359_v38, %v358_v37  ;;  %v361_v51 = vld [vmem:[%s1154_s3 + $0xb8] sm:$0xff] }
   0xa   :  { %v343_v44 = vld [vmem:[%s1154_s3 + $0x28] sm:$0xff]  ;;  %v374_v45 = vld [vmem:[%s1154_s3 + $0x120] sm:$0xff]  ;;  %v778_v49 = vpack.c.bf16 %v391_v42, %v390_v41  ;;  %v392_v54 = vld [vmem:[%s1154_s3 + $0x1b0] sm:$0xff]  ;;  %v750_v61 = vpack.c.bf16 %v361_v51, %v360_v50 }
   0xb   :  { %614 = vmatprep.subr.msk.mxu0 %vm87_vm0, %v63_v16  ;;  %623 = vmatprep.subr.msk.mxu1 %vm87_vm0, %v64_v17  ;;  %v375_v46 = vld [vmem:[%s1154_s3 + $0x128] sm:$0xff]  ;;  %v748_v52 = vpack.c.bf16 %v343_v44, %v342_v43  ;;  %v393_v55 = vld [vmem:[%s1154_s3 + $0x1b8] sm:$0xff]  ;;  %v344_v56 = vld [vmem:[%s1154_s3 + $0x30] sm:$0xff] }
   0xc   :  { %615 = vmatpush1.msk.msra.mxu0 %vm87_vm0, %v55_v9  ;;  %624 = vmatpush1.msk.msra.mxu1 %vm87_vm0, %v62_v10  ;;  %v780_v53 = vpack.c.bf16 %v375_v46, %v374_v45  ;;  %v345_v57 = vld [vmem:[%s1154_s3 + $0x38] sm:$0xff]  ;;  %v376_v58 = vld [vmem:[%s1154_s3 + $0x130] sm:$0xff]  ;;  %v782_v62 = vpack.c.bf16 %v393_v55, %v392_v54  ;;  %v362_v63 = vld [vmem:[%s1154_s3 + $0xc0] sm:$0xff]  ;;  %v37_v54 = vsub.s32 2, %v837_v5 }
   0xd   :  { %616 = vmatmul.mubr.msk.f32.vlgmr.msra.gmra.mrb[0].mxu0 %vm65_vm1, %v17_v21  ;;  %625 = vmatmul.mubr.msk.f32.vlgmr.msra.gmra.mrb[0].mxu1 %vm65_vm1, %v17_v21  ;;  %v377_v59 = vld [vmem:[%s1154_s3 + $0x138] sm:$0xff]  ;;  %v363_v0 = vld [vmem:[%s1154_s3 + $0xc8] sm:$0xff]  ;;  %v752_v1 = vpack.c.bf16 %v345_v57, %v344_v56  ;;  %v394_v3 = vld [vmem:[%s1154_s3 + $0x1c0] sm:$0xff]  ;;  %v33_v56 = vsub.s32 1, %v837_v5  ;;  %v41_v57 = vsub.s32 3, %v837_v5 }
   0xe   :  { %166 = vmatprep.mubr.f32.mxu0 %v806_v4  ;;  %273 = vmatprep.mubr.f32.mxu1 %v806_v4  ;;  %v20_v60 = vld [vmem:[%s1155_s0 + $0x18] sm:$0xff]  ;;  %v784_v2 = vpack.c.bf16 %v377_v59, %v376_v58  ;;  %v395_v6 = vld [vmem:[%s1154_s3 + $0x1c8] sm:$0xff]  ;;  %v346_v7 = vld [vmem:[%s1154_s3 + $0x40] sm:$0xff]  ;;  %v754_v12 = vpack.c.bf16 %v363_v0, %v362_v63 }
   0xf   :  { %739 = vmatprep.subr.bf16.mxu0 %v738_v22  ;;  %771 = vmatprep.subr.bf16.mxu1 %v770_v23  ;;  %v347_v8 = vld [vmem:[%s1154_s3 + $0x48] sm:$0xff]  ;;  %v378_v9 = vld [vmem:[%s1154_s3 + $0x140] sm:$0xff]  ;;  %v786_v13 = vpack.c.bf16 %v395_v6, %v394_v3  ;;  %v364_v14 = vld [vmem:[%s1154_s3 + $0xd0] sm:$0xff] }
  0x10   :  { %741 = vmatpush3.bf16.msra.mxu0 %v740_v26  ;;  %773 = vmatpush3.bf16.msra.mxu1 %v772_v27  ;;  %v379_v10 = vld [vmem:[%s1154_s3 + $0x148] sm:$0xff]  ;;  %v21_v11 = vld [vmem:[%s1155_s0 + $0x20] sm:$0xff]  ;;  %v365_v15 = vld [vmem:[%s1154_s3 + $0xd8] sm:$0xff]  ;;  %v756_v16 = vpack.c.bf16 %v347_v8, %v346_v7 }
  0x11   :  { %617 = vmatmul.mubr.msk.f32.gmra.mrb[2].mxu0 %vm65_vm1, %v18_v34  ;;  %626 = vmatmul.mubr.msk.f32.gmra.mrb[2].mxu1 %vm65_vm1, %v18_v34  ;;  %v788_v17 = vpack.c.bf16 %v379_v10, %v378_v9  ;;  %v396_v18 = vld [vmem:[%s1154_s3 + $0x1d0] sm:$0xff]  ;;  %v397_v19 = vld [vmem:[%s1154_s3 + $0x1d8] sm:$0xff]  ;;  %v22_v24 = vld [vmem:[%s1155_s0 + $0x28] sm:$0xff]  ;;  %v758_v26 = vpack.c.bf16 %v365_v15, %v364_v14 }
  0x12   :  { %172 = vmatprep.mubr.f32.mxu0 %v806_v4  ;;  %279 = vmatprep.mubr.f32.mxu1 %v806_v4  ;;  %v348_v20 = vld [vmem:[%s1154_s3 + $0x50] sm:$0xff]  ;;  %v349_v21 = vld [vmem:[%s1154_s3 + $0x58] sm:$0xff]  ;;  %v366_v25 = vld [vmem:[%s1154_s3 + $0xe0] sm:$0xff]  ;;  %v790_v27 = vpack.c.bf16 %v397_v19, %v396_v18 }
  0x13   :  { %743 = vmatprep.subr.bf16.mxu0 %v742_v35  ;;  %775 = vmatprep.subr.bf16.mxu1 %v774_v36  ;;  %v380_v22 = vld [vmem:[%s1154_s3 + $0x150] sm:$0xff]  ;;  %v381_v23 = vld [vmem:[%s1154_s3 + $0x158] sm:$0xff]  ;;  %v367_v28 = vld [vmem:[%s1154_s3 + $0xe8] sm:$0xff]  ;;  %v760_v31 = vpack.c.bf16 %v349_v21, %v348_v20 }
  0x14   :  { %745 = vmatpush3.bf16.msra.mxu0 %v744_v39  ;;  %777 = vmatpush3.bf16.msra.mxu1 %v776_v40  ;;  %v398_v29 = vld [vmem:[%s1154_s3 + $0x1e0] sm:$0xff]  ;;  %v399_v30 = vld [vmem:[%s1154_s3 + $0x1e8] sm:$0xff]  ;;  %v792_v32 = vpack.c.bf16 %v381_v23, %v380_v22  ;;  %v23_v33 = vld [vmem:[%s1155_s0 + $0x30] sm:$0x1]  ;;  %v762_v34 = vpack.c.bf16 %v367_v28, %v366_v25 }
  0x15   :  { %618 = vmatmul.mubr.msk.f32.gmra.mrb[4].mxu0 %vm65_vm1, %v19_v47  ;;  %627 = vmatmul.mubr.msk.f32.gmra.mrb[4].mxu1 %vm65_vm1, %v19_v47  ;;  %v794_v35 = vpack.c.bf16 %v399_v30, %v398_v29  ;;  %v351_v36 = vld [vmem:[%s1154_s3 + $0x68] sm:$0xff]  ;;  %v382_v37 = vld [vmem:[%s1154_s3 + $0x160] sm:$0xff]  ;;  %v368_v41 = vld [vmem:[%s1154_s3 + $0xf0] sm:$0xff] }
  0x16   :  { %178 = vmatprep.mubr.f32.mxu0 %v806_v4  ;;  %285 = vmatprep.mubr.f32.mxu1 %v806_v4  ;;  %v383_v39 = vld [vmem:[%s1154_s3 + $0x168] sm:$0xff]  ;;  %v369_v42 = vld [vmem:[%s1154_s3 + $0xf8] sm:$0xff]  ;;  %v400_v43 = vld [vmem:[%s1154_s3 + $0x1f0] sm:$0xff] }
  0x17   :  { %747 = vmatprep.subr.bf16.mxu0 %v746_v48  ;;  %779 = vmatprep.subr.bf16.mxu1 %v778_v49  ;;  %v796_v40 = vpack.c.bf16 %v383_v39, %v382_v37  ;;  %v766_v44 = vpack.c.bf16 %v369_v42, %v368_v41  ;;  %v401_v45 = vld [vmem:[%s1154_s3 + $0x1f8] sm:$0xff]  ;;  %v352_v46 = vld [vmem:[%s1154_s3 + $0x70] sm:$0xff]  ;;  %v25_v55 = vld [vmem:[%s1156_s2] sm:$0xf] }
  0x18   :  { %749 = vmatpush3.bf16.msra.mxu0 %v748_v52  ;;  %781 = vmatpush3.bf16.msra.mxu1 %v780_v53  ;;  %v353_v47 = vld [vmem:[%s1154_s3 + $0x78] sm:$0xff]  ;;  %v798_v48 = vpack.c.bf16 %v401_v45, %v400_v43  ;;  %v384_v50 = vld [vmem:[%s1154_s3 + $0x170] sm:$0xff]  ;;  %v29_v53 = vsub.s32 0, %v837_v5  ;;  %v1092_v59 = vrot.slane %v25_v55, %v37_v54 }
  0x19   :  { %619 = vmatmul.mubr.msk.f32.gmra.mrb[6].mxu0 %vm65_vm1, %v20_v60  ;;  %628 = vmatmul.mubr.msk.f32.gmra.mrb[6].mxu1 %vm65_vm1, %v20_v60  ;;  %v768_v49 = vpack.c.bf16 %v353_v47, %v352_v46  ;;  %v385_v51 = vld [vmem:[%s1154_s3 + $0x178] sm:$0xff]  ;;  %v1094_v60 = vrot.slane %v25_v55, %v33_v56 }
  0x1a   :  { %184 = vmatprep.mubr.f32.mxu0 %v806_v4  ;;  %291 = vmatprep.mubr.f32.mxu1 %v806_v4  ;;  %v800_v52 = vpack.c.bf16 %v385_v51, %v384_v50  ;;  %v1090_v58 = vrot.slane %v25_v55, %v29_v53 }
  0x1b   :  { %751 = vmatprep.subr.bf16.mxu0 %v750_v61  ;;  %783 = vmatprep.subr.bf16.mxu1 %v782_v62  ;;  %v1096_v61 = vrot.slane %v25_v55, %v41_v57 }
  0x1c   :  { %753 = vmatpush3.bf16.msra.mxu0 %v752_v1  ;;  %785 = vmatpush3.bf16.msra.mxu1 %v784_v2 }
  0x1d   :  { %620 = vmatmul.mubr.msk.f32.gmra.mrb[8].mxu0 %vm65_vm1, %v21_v11  ;;  %629 = vmatmul.mubr.msk.f32.gmra.mrb[8].mxu1 %vm65_vm1, %v21_v11 }
  0x1e   :  { %190 = vmatprep.mubr.f32.mxu0 %v806_v4  ;;  %297 = vmatprep.mubr.f32.mxu1 %v806_v4 }
  0x1f   :  { %755 = vmatprep.subr.bf16.mxu0 %v754_v12  ;;  %787 = vmatprep.subr.bf16.mxu1 %v786_v13 }
  0x20   :  { %757 = vmatpush3.bf16.msra.mxu0 %v756_v16  ;;  %789 = vmatpush3.bf16.msra.mxu1 %v788_v17 }
  0x21   :  { %621 = vmatmul.mubr.msk.f32.gmra.mrb[10].mxu0 %vm65_vm1, %v22_v24  ;;  %630 = vmatmul.mubr.msk.f32.gmra.mrb[10].mxu1 %vm65_vm1, %v22_v24 }
  0x22   :  { %196 = vmatprep.mubr.f32.mxu0 %v806_v4  ;;  %303 = vmatprep.mubr.f32.mxu1 %v806_v4  ;;  %v350_v4 = vld [vmem:[%s1154_s3 + $0x60] sm:$0xff] }
  0x23   :  { %759 = vmatprep.subr.bf16.mxu0 %v758_v26  ;;  %791 = vmatprep.subr.bf16.mxu1 %v790_v27  ;;  %v764_v38 = vpack.c.bf16 %v351_v36, %v350_v4 }
  0x24   :  { %761 = vmatpush3.bf16.msra.mxu0 %v760_v31  ;;  %793 = vmatpush3.bf16.msra.mxu1 %v792_v32 }
  0x25   :  { %622 = vmatmul.mubr.msk.f32.gmra.mrb[12].mxu0 %vm65_vm1, %v23_v33  ;;  %631 = vmatmul.mubr.msk.f32.gmra.mrb[12].mxu1 %vm65_vm1, %v23_v33 }
  0x26   :  { %763 = vmatprep.subr.bf16.mxu0 %v762_v34  ;;  %795 = vmatprep.subr.bf16.mxu1 %v794_v35 }
  0x28   :  { %765 = vmatpush3.bf16.msra.mxu0 %v764_v38  ;;  %797 = vmatpush3.bf16.msra.mxu1 %v796_v40 }
  0x29   :  { %767 = vmatprep.subr.bf16.mxu0 %v766_v44  ;;  %799 = vmatprep.subr.bf16.mxu1 %v798_v48 }
  0x2c   :  { %769 = vmatpush3.bf16.msra.mxu0 %v768_v49  ;;  %801 = vmatpush3.bf16.msra.mxu1 %v800_v52 }
  0xe0   :  { %v162_v62 = vpop.f32.mrb[0].mxu0  ;;  %v269_v63 = vpop.f32.mrb[0].mxu1 }
  0xe1   :  { %v163_v0 = vadd.f32 %v162_v62, %v1090_v58  ;;  %v270_v1 = vadd.f32 %v269_v63, %v1092_v59  ;;  %v164_v2 = vpop.f32.mrb[1].mxu0  ;;  %v271_v3 = vpop.f32.mrb[1].mxu1 }
  0xe2   :  { %v165_v6 = vadd.f32 %v164_v2, %v1094_v60  ;;  %v272_v5 = vadd.f32 %v271_v3, %v1096_v61 }
  0xe3   :  { %v310_v11 = vmax.f32 %v163_v0, 0.0  ;;  %v312_v12 = vmax.f32 %v270_v1, 0.0 }
  0xe4   :  { %v311_v7 = vmax.f32 %v165_v6, 0.0  ;;  %v313_v8 = vmax.f32 %v272_v5, 0.0  ;;  %v168_v9 = vpop.f32.mrb[2].mxu0  ;;  %v275_v10 = vpop.f32.mrb[2].mxu1 }
  0xe5   :  { %v169_v13 = vadd.f32 %v168_v9, %v1090_v58  ;;  %v276_v14 = vadd.f32 %v275_v10, %v1092_v59  ;;  %v170_v15 = vpop.f32.mrb[3].mxu0  ;;  %v277_v16 = vpop.f32.mrb[3].mxu1 }
  0xe6   :  { %v171_v17 = vadd.f32 %v170_v15, %v1094_v60  ;;  %v278_v18 = vadd.f32 %v277_v16, %v1096_v61  ;;  %466 = vmatprep.mubr.f32.mxu0 %v311_v7  ;;  %566 = vmatprep.mubr.f32.mxu1 %v313_v8 }
  0xe7   :  { %467 = vmatmul.mubr.f32.vlgmr.msra.gmra.mrb[14].mxu0 %v310_v11  ;;  %567 = vmatmul.mubr.f32.vlgmr.msra.gmra.mrb[14].mxu1 %v312_v12  ;;  %v314_v23 = vmax.f32 %v169_v13, 0.0  ;;  %v316_v24 = vmax.f32 %v276_v14, 0.0 }
  0xe8   :  { %v315_v19 = vmax.f32 %v171_v17, 0.0  ;;  %v317_v20 = vmax.f32 %v278_v18, 0.0  ;;  %v174_v21 = vpop.f32.mrb[4].mxu0  ;;  %v281_v22 = vpop.f32.mrb[4].mxu1 }
  0xe9   :  { %v175_v25 = vadd.f32 %v174_v21, %v1090_v58  ;;  %v282_v26 = vadd.f32 %v281_v22, %v1092_v59  ;;  %v176_v27 = vpop.f32.mrb[5].mxu0  ;;  %v283_v28 = vpop.f32.mrb[5].mxu1 }
  0xea   :  { %v177_v29 = vadd.f32 %v176_v27, %v1094_v60  ;;  %v284_v30 = vadd.f32 %v283_v28, %v1096_v61  ;;  %471 = vmatprep.mubr.f32.mxu0 %v315_v19  ;;  %571 = vmatprep.mubr.f32.mxu1 %v317_v20 }
  0xeb   :  { %472 = vmatmul.mubr.f32.gmra.mrb[16].mxu0 %v314_v23  ;;  %572 = vmatmul.mubr.f32.gmra.mrb[16].mxu1 %v316_v24  ;;  %v318_v35 = vmax.f32 %v175_v25, 0.0  ;;  %v320_v4 = vmax.f32 %v282_v26, 0.0 }
  0xec   :  { %v319_v31 = vmax.f32 %v177_v29, 0.0  ;;  %v321_v32 = vmax.f32 %v284_v30, 0.0  ;;  %v180_v33 = vpop.f32.mrb[6].mxu0  ;;  %v287_v34 = vpop.f32.mrb[6].mxu1 }
  0xed   :  { %v181_v36 = vadd.f32 %v180_v33, %v1090_v58  ;;  %v288_v37 = vadd.f32 %v287_v34, %v1092_v59  ;;  %v182_v38 = vpop.f32.mrb[7].mxu0  ;;  %v289_v39 = vpop.f32.mrb[7].mxu1 }
  0xee   :  { %v183_v40 = vadd.f32 %v182_v38, %v1094_v60  ;;  %v290_v41 = vadd.f32 %v289_v39, %v1096_v61  ;;  %476 = vmatprep.mubr.f32.mxu0 %v319_v31  ;;  %576 = vmatprep.mubr.f32.mxu1 %v321_v32 }
  0xef   :  { %477 = vmatmul.mubr.f32.gmra.mrb[18].mxu0 %v318_v35  ;;  %577 = vmatmul.mubr.f32.gmra.mrb[18].mxu1 %v320_v4  ;;  %v322_v46 = vmax.f32 %v181_v36, 0.0  ;;  %v324_v47 = vmax.f32 %v288_v37, 0.0 }
  0xf0   :  { %v323_v42 = vmax.f32 %v183_v40, 0.0  ;;  %v325_v43 = vmax.f32 %v290_v41, 0.0  ;;  %v186_v44 = vpop.f32.mrb[8].mxu0  ;;  %v293_v45 = vpop.f32.mrb[8].mxu1 }
  0xf1   :  { %v187_v48 = vadd.f32 %v186_v44, %v1090_v58  ;;  %v294_v49 = vadd.f32 %v293_v45, %v1092_v59  ;;  %v188_v50 = vpop.f32.mrb[9].mxu0  ;;  %v295_v51 = vpop.f32.mrb[9].mxu1 }
  0xf2   :  { %v189_v52 = vadd.f32 %v188_v50, %v1094_v60  ;;  %v296_v53 = vadd.f32 %v295_v51, %v1096_v61  ;;  %481 = vmatprep.mubr.f32.mxu0 %v323_v42  ;;  %581 = vmatprep.mubr.f32.mxu1 %v325_v43 }
  0xf3   :  { %482 = vmatmul.mubr.f32.gmra.mrb[20].mxu0 %v322_v46  ;;  %582 = vmatmul.mubr.f32.gmra.mrb[20].mxu1 %v324_v47  ;;  %v326_v62 = vmax.f32 %v187_v48, 0.0  ;;  %v328_v63 = vmax.f32 %v294_v49, 0.0 }
  0xf4   :  { %v327_v54 = vmax.f32 %v189_v52, 0.0  ;;  %v329_v55 = vmax.f32 %v296_v53, 0.0  ;;  %v192_v56 = vpop.f32.mrb[10].mxu0  ;;  %v299_v57 = vpop.f32.mrb[10].mxu1 }
  0xf5   :  { %v193_v0 = vadd.f32 %v192_v56, %v1090_v58  ;;  %v300_v1 = vadd.f32 %v299_v57, %v1092_v59  ;;  %v194_v2 = vpop.f32.mrb[11].mxu0  ;;  %v301_v3 = vpop.f32.mrb[11].mxu1 }
  0xf6   :  { %v195_v6 = vadd.f32 %v194_v2, %v1094_v60  ;;  %v302_v5 = vadd.f32 %v301_v3, %v1096_v61  ;;  %486 = vmatprep.mubr.f32.mxu0 %v327_v54  ;;  %586 = vmatprep.mubr.f32.mxu1 %v329_v55 }
  0xf7   :  { %487 = vmatmul.mubr.f32.gmra.mrb[22].mxu0 %v326_v62  ;;  %587 = vmatmul.mubr.f32.gmra.mrb[22].mxu1 %v328_v63  ;;  %v330_v11 = vmax.f32 %v193_v0, 0.0  ;;  %v332_v12 = vmax.f32 %v300_v1, 0.0 }
  0xf8   :  { %v331_v7 = vmax.f32 %v195_v6, 0.0  ;;  %v333_v8 = vmax.f32 %v302_v5, 0.0  ;;  %v198_v9 = vpop.f32.mrb[12].mxu0  ;;  %v305_v10 = vpop.f32.mrb[12].mxu1 }
  0xf9   :  { %v199_v13 = vadd.f32 %v198_v9, %v1090_v58  ;;  %v306_v14 = vadd.f32 %v305_v10, %v1092_v59  ;;  %v200_v15 = vpop.f32.mrb[13].mxu0  ;;  %v307_v16 = vpop.f32.mrb[13].mxu1 }
  0xfa   :  { %v201_v17 = vadd.f32 %v200_v15, %v1094_v60  ;;  %v308_v18 = vadd.f32 %v307_v16, %v1096_v61  ;;  %491 = vmatprep.mubr.f32.mxu0 %v331_v7  ;;  %591 = vmatprep.mubr.f32.mxu1 %v333_v8 }
  0xfb   :  { %492 = vmatmul.mubr.f32.gmra.mrb[24].mxu0 %v330_v11  ;;  %592 = vmatmul.mubr.f32.gmra.mrb[24].mxu1 %v332_v12  ;;  %v334_v21 = vmax.f32 %v199_v13, 0.0  ;;  %v336_v22 = vmax.f32 %v306_v14, 0.0 }
  0xfc   :  { %v335_v19 = vmax.f32 %v201_v17, 0.0  ;;  %v337_v20 = vmax.f32 %v308_v18, 0.0 }
  0xfe   :  { %496 = vmatprep.mubr.f32.mxu0 %v335_v19  ;;  %596 = vmatprep.mubr.f32.mxu1 %v337_v20 }
  0xff   :  { %497 = vmatmul.mubr.f32.gmra.mrb[26].mxu0 %v334_v21  ;;  %597 = vmatmul.mubr.f32.gmra.mrb[26].mxu1 %v336_v22 }
 0x1ba   :  { %v664_v58 = vpop.f32.mrb[14].mxu0  ;;  %v717_v59 = vpop.f32.mrb[14].mxu1 }
 0x1bb   :  { %v665_v23 = vpop.f32.mrb[15].mxu0  ;;  %v718_v24 = vpop.f32.mrb[15].mxu1 }
 0x1bc   :  { %v666_v25 = vadd.f32 %v665_v23, %v664_v58  ;;  %v719_v60 = vadd.f32 %v718_v24, %v717_v59 }
 0x1be   :  { %v569_v26 = vadd.f32 %v719_v60, %v666_v25  ;;  %v667_v61 = vpop.f32.mrb[16].mxu0  ;;  %v720_v27 = vpop.f32.mrb[16].mxu1 }
 0x1bf   :  { %v668_v28 = vpop.f32.mrb[17].mxu0  ;;  %v721_v29 = vpop.f32.mrb[17].mxu1 }
 0x1c0   :  { %602 = vst.msk [vmem:[%s1157_s4] sm:$0xff] %vm65_vm1, %v569_v26  ;;  %v669_v30 = vadd.f32 %v668_v28, %v667_v61  ;;  %v722_v31 = vadd.f32 %v721_v29, %v720_v27 }
 0x1c2   :  { %v574_v32 = vadd.f32 %v722_v31, %v669_v30  ;;  %v670_v33 = vpop.f32.mrb[18].mxu0  ;;  %v723_v34 = vpop.f32.mrb[18].mxu1 }
 0x1c3   :  { %v671_v35 = vpop.f32.mrb[19].mxu0  ;;  %v724_v4 = vpop.f32.mrb[19].mxu1 }
 0x1c4   :  { %603 = vst.msk [vmem:[%s1157_s4 + $0x8] sm:$0xff] %vm65_vm1, %v574_v32  ;;  %v672_v36 = vadd.f32 %v671_v35, %v670_v33  ;;  %v725_v37 = vadd.f32 %v724_v4, %v723_v34 }
 0x1c6   :  { %v579_v38 = vadd.f32 %v725_v37, %v672_v36  ;;  %v673_v39 = vpop.f32.mrb[20].mxu0  ;;  %v726_v40 = vpop.f32.mrb[20].mxu1 }
 0x1c7   :  { %v674_v41 = vpop.f32.mrb[21].mxu0  ;;  %v727_v42 = vpop.f32.mrb[21].mxu1 }
 0x1c8   :  { %604 = vst.msk [vmem:[%s1157_s4 + $0x10] sm:$0xff] %vm65_vm1, %v579_v38  ;;  %v675_v43 = vadd.f32 %v674_v41, %v673_v39  ;;  %v728_v44 = vadd.f32 %v727_v42, %v726_v40 }
 0x1ca   :  { %v584_v45 = vadd.f32 %v728_v44, %v675_v43  ;;  %v676_v46 = vpop.f32.mrb[22].mxu0  ;;  %v729_v47 = vpop.f32.mrb[22].mxu1 }
 0x1cb   :  { %v677_v48 = vpop.f32.mrb[23].mxu0  ;;  %v730_v49 = vpop.f32.mrb[23].mxu1 }
 0x1cc   :  { %605 = vst.msk [vmem:[%s1157_s4 + $0x18] sm:$0xff] %vm65_vm1, %v584_v45  ;;  %v678_v50 = vadd.f32 %v677_v48, %v676_v46  ;;  %v731_v51 = vadd.f32 %v730_v49, %v729_v47 }
 0x1ce   :  { %v589_v52 = vadd.f32 %v731_v51, %v678_v50  ;;  %v679_v53 = vpop.f32.mrb[24].mxu0  ;;  %v732_v54 = vpop.f32.mrb[24].mxu1 }
 0x1cf   :  { %v680_v55 = vpop.f32.mrb[25].mxu0  ;;  %v733_v56 = vpop.f32.mrb[25].mxu1 }
 0x1d0   :  { %606 = vst.msk [vmem:[%s1157_s4 + $0x20] sm:$0xff] %vm65_vm1, %v589_v52  ;;  %v681_v57 = vadd.f32 %v680_v55, %v679_v53  ;;  %v734_v62 = vadd.f32 %v733_v56, %v732_v54 }
 0x1d2   :  { %v594_v63 = vadd.f32 %v734_v62, %v681_v57  ;;  %v682_v0 = vpop.f32.mrb[26].mxu0  ;;  %v735_v1 = vpop.f32.mrb[26].mxu1 }
 0x1d3   :  { %v683_v2 = vpop.f32.mrb[27].mxu0  ;;  %v736_v3 = vpop.f32.mrb[27].mxu1 }
 0x1d4   :  { %607 = vst.msk [vmem:[%s1157_s4 + $0x28] sm:$0xff] %vm65_vm1, %v594_v63  ;;  %v684_v6 = vadd.f32 %v683_v2, %v682_v0  ;;  %v737_v5 = vadd.f32 %v736_v3, %v735_v1 }
 0x1d6   :  { %v599_v7 = vadd.f32 %v737_v5, %v684_v6 }
 0x1d8   :  { %609 = vst.msk [vmem:[%s1157_s4 + $0x30] sm:$0x1] %vm608_vm2, %v599_v7 }

</bundles_post_ra>
